<compile_context>
chip_gen: v7x
topology: tpu7x:2x2x1
jax: 0.10.0
libtpu: 0.0.40
codegen_flags: <defaults>
</compile_context>

<pallas_src>
import functools

import jax
import jax.numpy as jnp
from jax.experimental import pallas as pl
from jax.experimental.pallas import tpu as pltpu

LANE = 128
SUBLANE = 8
H1 = 256
H2 = 768  # phoBERT hidden size


def _round_up(x, m):
    return (x + m - 1) // m * m


def nn_head_kernel(true_b, feat_ref, bert_ref, lab_ref,
                   w1_ref, b1_ref, w2_ref, b2_ref, w3a_ref, w3b_ref, b3_ref,
                   logits_ref, loss_ref):
    i = pl.program_id(0)
    tile_b = feat_ref.shape[0]
    c_pad = b3_ref.shape[1]

    # x_nn = relu(fc1(features)); x_nn = relu(fc2(x_nn)); dropout = identity (eval).
    h1 = jnp.dot(feat_ref[...], w1_ref[...], preferred_element_type=jnp.float32)
    h1 = jnp.maximum(h1 + b1_ref[...], 0.0)
    h2 = jnp.dot(h1.astype(jnp.bfloat16), w2_ref[...],
                 preferred_element_type=jnp.float32)
    h2 = jnp.maximum(h2 + b2_ref[...], 0.0)

    # logits = out(cat(x_nn, x_bert)) == x_nn @ W3[:768] + x_bert @ W3[768:] + b3
    logits = (jnp.dot(h2.astype(jnp.bfloat16), w3a_ref[...],
                      preferred_element_type=jnp.float32)
              + jnp.dot(bert_ref[...], w3b_ref[...],
                        preferred_element_type=jnp.float32)
              + b3_ref[...])
    logits_ref[...] = logits

    # CrossEntropyLoss (mean reduction): accumulate the masked sum of
    # (logsumexp - target_logit) across batch tiles, scale by 1/B at the end.
    # Padded class lanes carry logits of -1e30 -> exp underflows to exactly 0.
    m = jnp.max(logits, axis=-1, keepdims=True)
    lse = m + jnp.log(jnp.sum(jnp.exp(logits - m), axis=-1, keepdims=True))
    class_ids = jax.lax.broadcasted_iota(jnp.int32, (tile_b, c_pad), 1)
    tgt = jnp.sum(jnp.where(class_ids == lab_ref[...], logits, 0.0),
                  axis=-1, keepdims=True)

    # Mask padded batch rows out of the loss.
    row_ids = i * tile_b + jax.lax.broadcasted_iota(jnp.int32, (tile_b, 1), 0)
    valid = (row_ids < true_b).astype(jnp.float32)
    part = jnp.sum((lse - tgt) * valid, axis=0, keepdims=True)  # (1, 1)

    @pl.when(i == 0)
    def _():
        loss_ref[...] = jnp.zeros_like(loss_ref)

    loss_ref[...] = loss_ref[...] + part

    @pl.when(i == pl.num_programs(0) - 1)
    def _():
        loss_ref[...] = loss_ref[...] * jnp.float32(1.0 / true_b)


@functools.partial(jax.jit, static_argnames=("num_classes",))
def nn_forward(features, input_ids, token_type_ids, attention_mask, labels,
               bert_cls, params, *, num_classes):
    del input_ids, token_type_ids, attention_mask  # consumed by phoBert stand-in
    B, input_size = features.shape
    c_pad = params["b3"].shape[1]

    # Batch tiling: weights stay VMEM-resident (constant index_map) across steps.
    tile_b = min(256, _round_up(B, SUBLANE))
    b_pad = _round_up(B, tile_b)
    num_tiles = b_pad // tile_b

    feats = jnp.zeros((b_pad, input_size), jnp.bfloat16)
    feats = feats.at[:B].set(features.astype(jnp.bfloat16))
    bert = jnp.zeros((b_pad, H2), jnp.bfloat16)
    bert = bert.at[:B].set(bert_cls.astype(jnp.bfloat16))
    labels2d = jnp.zeros((b_pad, 1), jnp.int32)
    labels2d = labels2d.at[:B, 0].set(labels.astype(jnp.int32))

    row_spec = lambda shape: pl.BlockSpec(shape, lambda i: (i, 0))
    res_spec = lambda shape: pl.BlockSpec(shape, lambda i: (0, 0))

    weight_bytes = sum(int(v.size) * v.dtype.itemsize for v in params.values())
    cost = pl.CostEstimate(
        flops=2 * b_pad * (input_size * H1 + H1 * H2 + 2 * H2 * c_pad),
        transcendentals=b_pad * c_pad + b_pad,
        bytes_accessed=(feats.size * 2 + bert.size * 2 + labels2d.size * 4
                        + weight_bytes + b_pad * c_pad * 4 + 4),
    )

    logits_pad, loss = pl.pallas_call(
        functools.partial(nn_head_kernel, B),
        out_shape=(
            jax.ShapeDtypeStruct((b_pad, c_pad), jnp.float32),
            jax.ShapeDtypeStruct((1, 1), jnp.float32),
        ),
        grid_spec=pltpu.PrefetchScalarGridSpec(
            num_scalar_prefetch=0,
            grid=(num_tiles,),
            in_specs=[
                row_spec((tile_b, input_size)),        # features
                row_spec((tile_b, H2)),                # bert_cls
                row_spec((tile_b, 1)),                 # labels
                res_spec((input_size, H1)),            # w1
                res_spec((1, H1)),                     # b1
                res_spec((H1, H2)),                    # w2
                res_spec((1, H2)),                     # b2
                res_spec((H2, c_pad)),                 # w3a (applied to x_nn)
                res_spec((H2, c_pad)),                 # w3b (applied to bert CLS)
                res_spec((1, c_pad)),                  # b3 (padded lanes = -1e30)
            ],
            out_specs=(
                row_spec((tile_b, c_pad)),             # logits (lane-dense, 128)
                pl.BlockSpec((1, 1), lambda i: (0, 0)),  # loss accumulator
            ),
        ),
        compiler_params=pltpu.CompilerParams(
            dimension_semantics=("arbitrary",)),
        cost_estimate=cost,
    )(feats, bert, labels2d,
      params["w1"], params["b1"],
      params["w2"], params["b2"],
      params["w3a"], params["w3b"], params["b3"])

    return logits_pad[:B, :num_classes], loss[0, 0]


def init_params(key, input_size, num_classes):
    c_pad = _round_up(num_classes, LANE)
    ks = jax.random.split(key, 6)

    def lin(kw, kb, fan_in, fan_out):
        bound = 1.0 / jnp.sqrt(fan_in)
        w = jax.random.uniform(kw, (fan_in, fan_out), jnp.float32, -bound, bound)
        b = jax.random.uniform(kb, (1, fan_out), jnp.float32, -bound, bound)
        return w, b

    w1, b1 = lin(ks[0], ks[1], input_size, H1)
    w2, b2 = lin(ks[2], ks[3], H1, H2)
    w3, b3 = lin(ks[4], ks[5], 2 * H2, num_classes)

    # Pad the class dim to 128 lanes; padded logits are forced to -1e30 via b3.
    w3_pad = jnp.zeros((2 * H2, c_pad), jnp.float32).at[:, :num_classes].set(w3)
    b3_pad = jnp.full((1, c_pad), -1e30, jnp.float32).at[:, :num_classes].set(b3)

    return {
        "w1": w1.astype(jnp.bfloat16), "b1": b1,
        "w2": w2.astype(jnp.bfloat16), "b2": b2,
        "w3a": w3_pad[:H2, :].astype(jnp.bfloat16),   # slice applied to x_nn
        "w3b": w3_pad[H2:, :].astype(jnp.bfloat16),   # slice applied to bert CLS
        "b3": b3_pad,
    }


def reference_forward(features, labels, bert_cls, params, num_classes):
    # Pure-JAX reference mimicking the kernel's bf16-input / f32-accumulate dots.
    f32 = jnp.float32
    bf = lambda x: x.astype(jnp.bfloat16).astype(f32)
    h1 = jnp.maximum(bf(features) @ params["w1"].astype(f32) + params["b1"], 0.0)
    h2 = jnp.maximum(bf(h1) @ params["w2"].astype(f32) + params["b2"], 0.0)
    logits = (bf(h2) @ params["w3a"].astype(f32)
              + bf(bert_cls) @ params["w3b"].astype(f32) + params["b3"])
    logits = logits[:, :num_classes]
    lse = jax.nn.logsumexp(logits, axis=-1)
    tgt = jnp.take_along_axis(logits, labels[:, None], axis=-1)[:, 0]
    return logits, jnp.mean(lse - tgt)


if __name__ == "__main__":
    key = jax.random.PRNGKey(0)
    k_feat, k_bert, k_ids, k_lab, k_par = jax.random.split(key, 5)

    B = 8            # batch
    input_size = 32  # feature dim
    seq = 16         # token sequence length (consumed by the phoBert stand-in)
    num_classes = 8

    features = jax.random.normal(k_feat, (B, input_size), jnp.float32)
    input_ids = jax.random.randint(k_ids, (B, seq), 0, 1000, dtype=jnp.int32)
    token_type_ids = jnp.zeros((B, seq), jnp.int32)
    attention_mask = jnp.ones((B, seq), jnp.int32)
    labels = jax.random.randint(k_lab, (B,), 0, num_classes, dtype=jnp.int32)
    # TODO(synk): deterministic stand-in for phoBert(...).last_hidden_state[:, 0, :]
    bert_cls = jax.random.normal(k_bert, (B, H2), jnp.float32)

    params = init_params(k_par, input_size, num_classes)

    logits, loss = nn_forward(features, input_ids, token_type_ids,
                              attention_mask, labels, bert_cls, params,
                              num_classes=num_classes)
    jax.block_until_ready((logits, loss))

    ref_logits, ref_loss = reference_forward(features, labels, bert_cls,
                                             params, num_classes)
    assert logits.shape == (B, num_classes)
    assert bool(jnp.isfinite(loss))
    assert jnp.allclose(logits, ref_logits, atol=5e-2, rtol=5e-2), "logits mismatch"
    assert jnp.allclose(loss, ref_loss, atol=1e-2), "loss mismatch"
    print("KERNEL_OK")
</pallas_src>

<mosaic_0001>
module attributes {stable_mosaic.version = 11 : i64} {
  func.func @nn_head_kernel(%arg0: i32, %arg1: memref<8x32xbf16, #tpu.memory_space<vmem>>, %arg2: memref<8x768xbf16, #tpu.memory_space<vmem>>, %arg3: memref<8x1xi32, #tpu.memory_space<vmem>>, %arg4: memref<32x256xbf16, #tpu.memory_space<vmem>>, %arg5: memref<1x256xf32, #tpu.memory_space<vmem>>, %arg6: memref<256x768xbf16, #tpu.memory_space<vmem>>, %arg7: memref<1x768xf32, #tpu.memory_space<vmem>>, %arg8: memref<768x128xbf16, #tpu.memory_space<vmem>>, %arg9: memref<768x128xbf16, #tpu.memory_space<vmem>>, %arg10: memref<1x128xf32, #tpu.memory_space<vmem>>, %arg11: memref<8x128xf32, #tpu.memory_space<vmem>>, %arg12: memref<1x1xf32, #tpu.memory_space<vmem>>) attributes {dimension_semantics = [#tpu.dimension_semantics<arbitrary>], iteration_bounds = array<i64: 1>, scalar_prefetch = 0 : i64, scratch_operands = 0 : i64, tpu.core_type = #tpu.core_type<tc>, window_params = [{transform_indices = @transform_0, window_bounds = array<i64: 8, 32>}, {transform_indices = @transform_1, window_bounds = array<i64: 8, 768>}, {transform_indices = @transform_2, window_bounds = array<i64: 8, 1>}, {pipeline_mode = #tpu.pipeline_mode<synchronous>, transform_indices = @transform_3, window_bounds = array<i64: 32, 256>}, {pipeline_mode = #tpu.pipeline_mode<synchronous>, transform_indices = @transform_4, window_bounds = array<i64: 1, 256>}, {pipeline_mode = #tpu.pipeline_mode<synchronous>, transform_indices = @transform_5, window_bounds = array<i64: 256, 768>}, {pipeline_mode = #tpu.pipeline_mode<synchronous>, transform_indices = @transform_6, window_bounds = array<i64: 1, 768>}, {pipeline_mode = #tpu.pipeline_mode<synchronous>, transform_indices = @transform_7, window_bounds = array<i64: 768, 128>}, {pipeline_mode = #tpu.pipeline_mode<synchronous>, transform_indices = @transform_8, window_bounds = array<i64: 768, 128>}, {pipeline_mode = #tpu.pipeline_mode<synchronous>, transform_indices = @transform_9, window_bounds = array<i64: 1, 128>}, {transform_indices = @transform_10, window_bounds = array<i64: 8, 128>}, {pipeline_mode = #tpu.pipeline_mode<synchronous>, transform_indices = @transform_11, window_bounds = array<i64: 1, 1>}]} {
    %c0 = arith.constant 0 : index
    %c0_0 = arith.constant 0 : index
    %0 = vector.load %arg1[%c0, %c0_0] : memref<8x32xbf16, #tpu.memory_space<vmem>>, vector<8x32xbf16>
    %c0_1 = arith.constant 0 : index
    %c0_2 = arith.constant 0 : index
    %1 = vector.load %arg4[%c0_1, %c0_2] : memref<32x256xbf16, #tpu.memory_space<vmem>>, vector<32x256xbf16>
    %cst = arith.constant dense<0.000000e+00> : vector<8x256xf32>
    %2 = tpu.matmul %0, %1, %cst {dimension_numbers = #tpu.dot_dimension_numbers<[1], [0], [0], [1], [0, 0, 1, 1], [], []>} : vector<8x32xbf16>, vector<32x256xbf16>, vector<8x256xf32> -> vector<8x256xf32>
    %c0_3 = arith.constant 0 : index
    %c0_4 = arith.constant 0 : index
    %3 = vector.load %arg5[%c0_3, %c0_4] : memref<1x256xf32, #tpu.memory_space<vmem>>, vector<1x256xf32>
    %4 = vector.broadcast %3 : vector<1x256xf32> to vector<8x256xf32>
    %5 = arith.addf %2, %4 : vector<8x256xf32>
    %cst_5 = arith.constant 0.000000e+00 : f32
    %6 = vector.broadcast %cst_5 : f32 to vector<8x256xf32>
    %7 = arith.maximumf %5, %6 : vector<8x256xf32>
    %8 = arith.truncf %7 : vector<8x256xf32> to vector<8x256xbf16>
    %c0_6 = arith.constant 0 : index
    %c0_7 = arith.constant 0 : index
    %9 = vector.load %arg6[%c0_6, %c0_7] : memref<256x768xbf16, #tpu.memory_space<vmem>>, vector<256x768xbf16>
    %cst_8 = arith.constant dense<0.000000e+00> : vector<8x768xf32>
    %10 = tpu.matmul %8, %9, %cst_8 {dimension_numbers = #tpu.dot_dimension_numbers<[1], [0], [0], [1], [0, 0, 1, 1], [], []>} : vector<8x256xbf16>, vector<256x768xbf16>, vector<8x768xf32> -> vector<8x768xf32>
    %c0_9 = arith.constant 0 : index
    %c0_10 = arith.constant 0 : index
    %11 = vector.load %arg7[%c0_9, %c0_10] : memref<1x768xf32, #tpu.memory_space<vmem>>, vector<1x768xf32>
    %12 = vector.broadcast %11 : vector<1x768xf32> to vector<8x768xf32>
    %13 = arith.addf %10, %12 : vector<8x768xf32>
    %cst_11 = arith.constant 0.000000e+00 : f32
    %14 = vector.broadcast %cst_11 : f32 to vector<8x768xf32>
    %15 = arith.maximumf %13, %14 : vector<8x768xf32>
    %16 = arith.truncf %15 : vector<8x768xf32> to vector<8x768xbf16>
    %c0_12 = arith.constant 0 : index
    %c0_13 = arith.constant 0 : index
    %17 = vector.load %arg8[%c0_12, %c0_13] : memref<768x128xbf16, #tpu.memory_space<vmem>>, vector<768x128xbf16>
    %cst_14 = arith.constant dense<0.000000e+00> : vector<8x128xf32>
    %18 = tpu.matmul %16, %17, %cst_14 {dimension_numbers = #tpu.dot_dimension_numbers<[1], [0], [0], [1], [0, 0, 1, 1], [], []>} : vector<8x768xbf16>, vector<768x128xbf16>, vector<8x128xf32> -> vector<8x128xf32>
    %c0_15 = arith.constant 0 : index
    %c0_16 = arith.constant 0 : index
    %19 = vector.load %arg2[%c0_15, %c0_16] : memref<8x768xbf16, #tpu.memory_space<vmem>>, vector<8x768xbf16>
    %c0_17 = arith.constant 0 : index
    %c0_18 = arith.constant 0 : index
    %20 = vector.load %arg9[%c0_17, %c0_18] : memref<768x128xbf16, #tpu.memory_space<vmem>>, vector<768x128xbf16>
    %cst_19 = arith.constant dense<0.000000e+00> : vector<8x128xf32>
    %21 = tpu.matmul %19, %20, %cst_19 {dimension_numbers = #tpu.dot_dimension_numbers<[1], [0], [0], [1], [0, 0, 1, 1], [], []>} : vector<8x768xbf16>, vector<768x128xbf16>, vector<8x128xf32> -> vector<8x128xf32>
    %22 = arith.addf %18, %21 : vector<8x128xf32>
    %c0_20 = arith.constant 0 : index
    %c0_21 = arith.constant 0 : index
    %23 = vector.load %arg10[%c0_20, %c0_21] : memref<1x128xf32, #tpu.memory_space<vmem>>, vector<1x128xf32>
    %24 = vector.broadcast %23 : vector<1x128xf32> to vector<8x128xf32>
    %25 = arith.addf %22, %24 : vector<8x128xf32>
    %c0_22 = arith.constant 0 : index
    %c0_23 = arith.constant 0 : index
    %26 = vector.load %arg11[%c0_22, %c0_23] : memref<8x128xf32, #tpu.memory_space<vmem>>, vector<8x128xf32>
    tpu.vector_store %arg11[%c0_22, %c0_23], %25 {strides = array<i32>} : memref<8x128xf32, #tpu.memory_space<vmem>>, vector<8x128xf32>,
    %cst_24 = arith.constant dense<0xFF800000> : vector<8xf32>
    %27 = vector.multi_reduction <maximumf>, %25, %cst_24 [1] : vector<8x128xf32> to vector<8xf32>
    %28 = vector.shape_cast %27 : vector<8xf32> to vector<8x1xf32>
    %29 = vector.broadcast %28 : vector<8x1xf32> to vector<8x128xf32>
    %30 = arith.subf %25, %29 : vector<8x128xf32>
    %31 = math.exp %30 : vector<8x128xf32>
    %cst_25 = arith.constant dense<0.000000e+00> : vector<8xf32>
    %32 = vector.multi_reduction <add>, %31, %cst_25 [1] : vector<8x128xf32> to vector<8xf32>
    %33 = vector.shape_cast %32 : vector<8xf32> to vector<8x1xf32>
    %34 = math.log %33 : vector<8x1xf32>
    %35 = arith.addf %28, %34 : vector<8x1xf32>
    %36 = tpu.iota {dimensions = array<i32: 1>} : vector<8x128xi32>
    %c0_26 = arith.constant 0 : index
    %c0_27 = arith.constant 0 : index
    %37 = vector.load %arg3[%c0_26, %c0_27] : memref<8x1xi32, #tpu.memory_space<vmem>>, vector<8x1xi32>
    %38 = vector.broadcast %37 : vector<8x1xi32> to vector<8x128xi32>
    %39 = arith.cmpi eq, %36, %38 : vector<8x128xi32>
    %cst_28 = arith.constant 0.000000e+00 : f32
    %40 = vector.broadcast %cst_28 : f32 to vector<8x128xf32>
    %41 = arith.select %39, %25, %40 : vector<8x128xi1>, vector<8x128xf32>
    %cst_29 = arith.constant dense<0.000000e+00> : vector<8xf32>
    %42 = vector.multi_reduction <add>, %41, %cst_29 [1] : vector<8x128xf32> to vector<8xf32>
    %43 = vector.shape_cast %42 : vector<8xf32> to vector<8x1xf32>
    %c8_i32 = arith.constant 8 : i32
    %44 = arith.muli %arg0, %c8_i32 : i32
    %45 = tpu.iota {dimensions = array<i32: 0>} : vector<8x1xi32>
    %46 = vector.broadcast %44 : i32 to vector<8x1xi32>
    %47 = arith.addi %46, %45 : vector<8x1xi32>
    %c8_i32_30 = arith.constant 8 : i32
    %48 = vector.broadcast %c8_i32_30 : i32 to vector<8x1xi32>
    %49 = arith.cmpi slt, %47, %48 : vector<8x1xi32>
    %50 = arith.extui %49 : vector<8x1xi1> to vector<8x1xi32>
    %51 = arith.sitofp %50 : vector<8x1xi32> to vector<8x1xf32>
    %52 = arith.subf %35, %43 : vector<8x1xf32>
    %53 = arith.mulf %52, %51 : vector<8x1xf32>
    %cst_31 = arith.constant dense<0.000000e+00> : vector<1xf32>
    %54 = vector.multi_reduction <add>, %53, %cst_31 [0] : vector<8x1xf32> to vector<1xf32>
    %55 = vector.shape_cast %54 : vector<1xf32> to vector<1x1xf32>
    %c0_i32 = arith.constant 0 : i32
    %56 = arith.cmpi eq, %arg0, %c0_i32 : i32
    %57 = arith.extui %56 : i1 to i32
    %c0_i32_32 = arith.constant 0 : i32
    %58 = arith.cmpi ne, %57, %c0_i32_32 : i32
    scf.if %58 {
      %cst_39 = arith.constant 0.000000e+00 : f32
      %65 = vector.broadcast %cst_39 : f32 to vector<1x1xf32>
      %c0_40 = arith.constant 0 : index
      %c0_41 = arith.constant 0 : index
      %66 = vector.load %arg12[%c0_40, %c0_41] : memref<1x1xf32, #tpu.memory_space<vmem>>, vector<1x1xf32>
      tpu.vector_store %arg12[%c0_40, %c0_41], %65 {strides = array<i32>} : memref<1x1xf32, #tpu.memory_space<vmem>>, vector<1x1xf32>,
    } else {
    }
    %c0_33 = arith.constant 0 : index
    %c0_34 = arith.constant 0 : index
    %59 = vector.load %arg12[%c0_33, %c0_34] : memref<1x1xf32, #tpu.memory_space<vmem>>, vector<1x1xf32>
    %60 = arith.addf %59, %55 : vector<1x1xf32>
    %c0_35 = arith.constant 0 : index
    %c0_36 = arith.constant 0 : index
    %61 = vector.load %arg12[%c0_35, %c0_36] : memref<1x1xf32, #tpu.memory_space<vmem>>, vector<1x1xf32>
    tpu.vector_store %arg12[%c0_35, %c0_36], %60 {strides = array<i32>} : memref<1x1xf32, #tpu.memory_space<vmem>>, vector<1x1xf32>,
    %c0_i32_37 = arith.constant 0 : i32
    %62 = arith.cmpi eq, %arg0, %c0_i32_37 : i32
    %63 = arith.extui %62 : i1 to i32
    %c0_i32_38 = arith.constant 0 : i32
    %64 = arith.cmpi ne, %63, %c0_i32_38 : i32
    scf.if %64 {
      %c0_39 = arith.constant 0 : index
      %c0_40 = arith.constant 0 : index
      %65 = vector.load %arg12[%c0_39, %c0_40] : memref<1x1xf32, #tpu.memory_space<vmem>>, vector<1x1xf32>
      %cst_41 = arith.constant 1.250000e-01 : f32
      %66 = vector.broadcast %cst_41 : f32 to vector<1x1xf32>
      %67 = arith.mulf %65, %66 : vector<1x1xf32>
      %c0_42 = arith.constant 0 : index
      %c0_43 = arith.constant 0 : index
      %68 = vector.load %arg12[%c0_42, %c0_43] : memref<1x1xf32, #tpu.memory_space<vmem>>, vector<1x1xf32>
      tpu.vector_store %arg12[%c0_42, %c0_43], %67 {strides = array<i32>} : memref<1x1xf32, #tpu.memory_space<vmem>>, vector<1x1xf32>,
    } else {
    }
    return
  }
  func.func @transform_0(%arg0: i32) -> (i32, i32) {
    %c0_i32 = arith.constant 0 : i32
    %c0_i32_0 = arith.constant 0 : i32
    return %arg0, %c0_i32 : i32, i32
  }
  func.func @transform_1(%arg0: i32) -> (i32, i32) {
    %c0_i32 = arith.constant 0 : i32
    %c0_i32_0 = arith.constant 0 : i32
    return %arg0, %c0_i32 : i32, i32
  }
  func.func @transform_2(%arg0: i32) -> (i32, i32) {
    %c0_i32 = arith.constant 0 : i32
    %c0_i32_0 = arith.constant 0 : i32
    return %arg0, %c0_i32 : i32, i32
  }
  func.func @transform_3(%arg0: i32) -> (i32, i32) {
    %c0_i32 = arith.constant 0 : i32
    %c0_i32_0 = arith.constant 0 : i32
    %c0_i32_1 = arith.constant 0 : i32
    return %c0_i32, %c0_i32_0 : i32, i32
  }
  func.func @transform_4(%arg0: i32) -> (i32, i32) {
    %c0_i32 = arith.constant 0 : i32
    %c0_i32_0 = arith.constant 0 : i32
    %c0_i32_1 = arith.constant 0 : i32
    return %c0_i32, %c0_i32_0 : i32, i32
  }
  func.func @transform_5(%arg0: i32) -> (i32, i32) {
    %c0_i32 = arith.constant 0 : i32
    %c0_i32_0 = arith.constant 0 : i32
    %c0_i32_1 = arith.constant 0 : i32
    return %c0_i32, %c0_i32_0 : i32, i32
  }
  func.func @transform_6(%arg0: i32) -> (i32, i32) {
    %c0_i32 = arith.constant 0 : i32
    %c0_i32_0 = arith.constant 0 : i32
    %c0_i32_1 = arith.constant 0 : i32
    return %c0_i32, %c0_i32_0 : i32, i32
  }
  func.func @transform_7(%arg0: i32) -> (i32, i32) {
    %c0_i32 = arith.constant 0 : i32
    %c0_i32_0 = arith.constant 0 : i32
    %c0_i32_1 = arith.constant 0 : i32
    return %c0_i32, %c0_i32_0 : i32, i32
  }
  func.func @transform_8(%arg0: i32) -> (i32, i32) {
    %c0_i32 = arith.constant 0 : i32
    %c0_i32_0 = arith.constant 0 : i32
    %c0_i32_1 = arith.constant 0 : i32
    return %c0_i32, %c0_i32_0 : i32, i32
  }
  func.func @transform_9(%arg0: i32) -> (i32, i32) {
    %c0_i32 = arith.constant 0 : i32
    %c0_i32_0 = arith.constant 0 : i32
    %c0_i32_1 = arith.constant 0 : i32
    return %c0_i32, %c0_i32_0 : i32, i32
  }
  func.func @transform_10(%arg0: i32) -> (i32, i32) {
    %c0_i32 = arith.constant 0 : i32
    %c0_i32_0 = arith.constant 0 : i32
    return %arg0, %c0_i32 : i32, i32
  }
  func.func @transform_11(%arg0: i32) -> (i32, i32) {
    %c0_i32 = arith.constant 0 : i32
    %c0_i32_0 = arith.constant 0 : i32
    %c0_i32_1 = arith.constant 0 : i32
    return %c0_i32, %c0_i32_0 : i32, i32
  }
}

</mosaic_0001>

<bundles_post_ra>
// kernel: nn_forward.1
= control target key start
LH: loop header
LB: loop body
LE: loop exit
PB: predicated region body
PF: predicated region fallthrough
CT: control target
= control target key end

     0   :  { %17 = vsyncpa [#allocation3], 0  ;;  %s2980_s0 = inlined_call_operand.vmem [shape: bf16[8,32], index: 0, kind: input, shape index: {}]   ;;  %s2981_s1 = inlined_call_operand.vmem [shape: bf16[8,768], index: 1, kind: input, shape index: {}]   ;;  %s2982_s2 = inlined_call_operand.vmem [shape: s32[8,1], index: 2, kind: input, shape index: {}]   ;;  %s2983_s3 = inlined_call_operand.vmem [shape: bf16[32,256], index: 3, kind: input, shape index: {}]   ;;  %s2984_s4 = inlined_call_operand.vmem [shape: f32[1,256], index: 4, kind: input, shape index: {}]   ;;  %s2985_s5 = inlined_call_operand.hbm [shape: bf16[256,768], index: 5, kind: input, shape index: {}]   ;;  %s2986_s6 = inlined_call_operand.vmem [shape: f32[1,768], index: 6, kind: input, shape index: {}]   ;;  %s2987_s7 = inlined_call_operand.hbm [shape: bf16[768,128], index: 7, kind: input, shape index: {}]   ;;  %s2988_s8 = inlined_call_operand.hbm [shape: bf16[768,128], index: 8, kind: input, shape index: {}]   ;;  %s2989_s9 = inlined_call_operand.vmem [shape: f32[1,128], index: 9, kind: input, shape index: {}]   ;;  %s2990_s10 = inlined_call_operand.hbm [shape: f32[8,128], index: 10, kind: output, shape index: {0}]   ;;  %s2991_s11 = inlined_call_operand.hbm [shape: f32[1,1], index: 11, kind: output, shape index: {1}]  }
   0x1   :  { %18 = vsyncpa [#allocation6], 0 }
   0x2   :  { %19 = vsyncpa [#allocation4], 0 }
   0x3   :  { %20 = vsyncpa [#allocation10], 0  ;;  %s2755_s17 = smov [#allocation5]   ;;  %s2637_s21 = scalar_lea.hbm %s2987_s7, 6144 }
   0x4   :  { %s50_s18 = sshll.u32 %s2755_s17, 4  ;;  %p2638_p0 = scmp.ne.s32.totalorder %s2987_s7, %s2637_s21  ;;  %s51_s18 = int_to_ptr.vmem [resolvable:$true] %s50_s18 }
   0x5   :  { %p2641_p1 = scmp.lt.u32.totalorder %s2637_s21, %s2987_s7 }
   0x7   :  { %p2643_p2 = pnand %p2641_p1, %p2638_p0 }
   0x9   :  { %2646 = shalt.err (!%p2643_p2)
}
   0xa   :  { %s2647_s26 = scalar_lea.vmem %s51_s18, 6144  ;;  %p2652_p4 = scmp.lt.s32.totalorder %s51_s18, %s51_s18 }
   0xb   :  { %p2648_p3 = scmp.ne.s32.totalorder %s51_s18, %s2647_s26  ;;  %p2653_p5 = scmp.lt.s32.totalorder %s2647_s26, %s2647_s26 }
   0xd   :  { %p2654_p6 = por %p2653_p5, %p2652_p4 }
   0xf   :  { %p2655_p7 = pnand %p2654_p6, %p2648_p3 }
  0x11   :  { %2658 = shalt.err (!%p2655_p7)
}
  0x12   :  { %s2756_s27 = smov 64   ;;  %s2757_s28 = smov 4  }
  0x13   :  { %56 = dma.hbm_to_vmem [thread:$0]  %s2987_s7, 6144, %s51_s18, [#allocation6], %s2756_s27, %s2756_s27, %s2757_s28  }
  0x14   :  { %s2758_s12 = smov [#allocation2]   ;;  %s2659_s16 = scalar_lea.hbm %s2985_s5, 12288 }
  0x15   :  { %s36_s13 = sshll.u32 %s2758_s12, 4  ;;  %p2660_p8 = scmp.ne.s32.totalorder %s2985_s5, %s2659_s16  ;;  %s37_s13 = int_to_ptr.vmem [resolvable:$true] %s36_s13 }
  0x16   :  { %p2663_p9 = scmp.lt.u32.totalorder %s2659_s16, %s2985_s5 }
  0x18   :  { %p2665_p10 = pnand %p2663_p9, %p2660_p8 }
  0x1a   :  { %2668 = shalt.err (!%p2665_p10)
}
  0x1b   :  { %s2669_s22 = scalar_lea.vmem %s37_s13, 12288  ;;  %p2674_p12 = scmp.lt.s32.totalorder %s37_s13, %s37_s13 }
  0x1c   :  { %p2670_p11 = scmp.ne.s32.totalorder %s37_s13, %s2669_s22  ;;  %p2675_p13 = scmp.lt.s32.totalorder %s2669_s22, %s2669_s22 }
  0x1e   :  { %p2676_p0 = por %p2675_p13, %p2674_p12 }
  0x20   :  { %p2677_p1 = pnand %p2676_p0, %p2670_p11 }
  0x22   :  { %2680 = shalt.err (!%p2677_p1)
}
  0x23   :  { %s2759_s7 = smov 384   ;;  %s2760_s18 = smov 24  }
  0x24   :  { %42 = dma.hbm_to_vmem [thread:$0]  %s2985_s5, 12288, %s37_s13, [#allocation3], %s2759_s7, %s2759_s7, %s2760_s18  }
  0x25   :  { %s2761_s25 = smov [#allocation7]   ;;  %s2681_s12 = scalar_lea.hbm %s2988_s8, 6144 }
  0x26   :  { %s62_s26 = sshll.u32 %s2761_s25, 4  ;;  %p2682_p2 = scmp.ne.s32.totalorder %s2988_s8, %s2681_s12  ;;  %s63_s26 = int_to_ptr.vmem [resolvable:$true] %s62_s26 }
  0x27   :  { %p2685_p3 = scmp.lt.u32.totalorder %s2681_s12, %s2988_s8 }
  0x29   :  { %p2687_p4 = pnand %p2685_p3, %p2682_p2 }
  0x2b   :  { %2690 = shalt.err (!%p2687_p4)
}
  0x2c   :  { %s2691_s19 = scalar_lea.vmem %s63_s26, 6144  ;;  %p2696_p6 = scmp.lt.s32.totalorder %s63_s26, %s63_s26 }
  0x2d   :  { %p2692_p5 = scmp.ne.s32.totalorder %s63_s26, %s2691_s19  ;;  %p2697_p7 = scmp.lt.s32.totalorder %s2691_s19, %s2691_s19 }
  0x2f   :  { %p2698_p8 = por %p2697_p7, %p2696_p6 }
  0x31   :  { %p2699_p9 = pnand %p2698_p8, %p2692_p5 }
  0x33   :  { %2702 = shalt.err (!%p2699_p9)
}
  0x34   :  { %68 = dma.hbm_to_vmem [thread:$0]  %s2988_s8, 6144, %s63_s26, [#allocation6], %s2756_s27, %s2756_s27, %s2757_s28  }
  0x35   :  { %2747 = dma.done.wait [#allocation3], 12288  }
  0x36   :  { %2748 = vsyncadd [#allocation3], 4294955008 }
  0x37   :  { %2749 = dma.done.wait [#allocation6], 12288  }
  0x38   :  { %2750 = vsyncadd [#allocation6], 4294955008  ;;  %v2762_v0 = vmov 0   ;;  %v2381_v1 = vld [vmem:[%s2983_s3 + $0x4] ss:$8 sps:$4 sm:$0xff]   ;;  %vm118_vm0 = vcmask 261120  }
  0x39   :  { %154 = vmatprep.mubr.bf16.mxu0 %v2762_v0  ;;  %2380 = vset.pattern.permute.xlu0 %v2762_v0  ;;  %v2383_v2 = vld [vmem:[%s2983_s3] ss:$8 sps:$4 sm:$0xff]   ;;  %v2384_v3 = vld [vmem:[%s2983_s3 + $0x14] ss:$8 sps:$4 sm:$0xff]   ;;  %v2386_v4 = vld [vmem:[%s2983_s3 + $0x10] ss:$8 sps:$4 sm:$0xff]  }
  0x3a   :  { %122 = vmatprep.subr.bf16.mxu0 %v2381_v1  ;;  %v2387_v5 = vld [vmem:[#allocation2 + $0x4] ss:$24 sps:$4 sm:$0xff]   ;;  %v2389_v6 = vld [vmem:[#allocation2] ss:$24 sps:$4 sm:$0xff]   ;;  %v2393_v9 = vld [vmem:[#allocation2 + $0x34] ss:$24 sps:$4 sm:$0xff]  }
  0x3b   :  { %123 = vmatpush1.bf16.msra.mxu0 %v2383_v2  ;;  %v81_v7 = vld [vmem:[%s2980_s0] sm:$0xf]  ;;  %775 = vmatprep.subr.bf16.mxu1 %v2387_v5  ;;  %v2392_v8 = vld [vmem:[#allocation2 + $0xc] ss:$24 sps:$4 sm:$0xff]   ;;  %v2395_v10 = vld [vmem:[#allocation2 + $0x30] ss:$24 sps:$4 sm:$0xff]  }
  0x3c   :  { %124 = vmatprep.subr.bf16.mxu0 %v2384_v3  ;;  %776 = vmatpush1.bf16.msra.mxu1 %v2389_v6  ;;  %v2390_v11 = vld [vmem:[#allocation2 + $0x8] ss:$24 sps:$4 sm:$0xff]   ;;  %v2398_v12 = vld [vmem:[#allocation2 + $0x3c] ss:$24 sps:$4 sm:$0xff]   ;;  %v2396_v14 = vld [vmem:[#allocation2 + $0x38] ss:$24 sps:$4 sm:$0xff]  }
  0x3d   :  { %777 = vmatprep.subr.bf16.mxu1 %v2393_v9  ;;  %v2399_v13 = vld [vmem:[#allocation2 + $0x64] ss:$24 sps:$4 sm:$0xff]   ;;  %v2401_v15 = vld [vmem:[#allocation2 + $0x60] ss:$24 sps:$4 sm:$0xff]   ;;  %v2405_v16 = vld [vmem:[#allocation2 + $0x94] ss:$24 sps:$4 sm:$0xff]  }
  0x3e   :  { %v2404_v17 = vld [vmem:[#allocation2 + $0x6c] ss:$24 sps:$4 sm:$0xff]   ;;  %v2402_v18 = vld [vmem:[#allocation2 + $0x68] ss:$24 sps:$4 sm:$0xff]   ;;  %v2410_v21 = vld [vmem:[#allocation2 + $0x9c] ss:$24 sps:$4 sm:$0xff]  }
  0x3f   :  { %125 = vmatpush1.bf16.msra.mxu0 %v2386_v4  ;;  %v2407_v19 = vld [vmem:[#allocation2 + $0x90] ss:$24 sps:$4 sm:$0xff]   ;;  %v2411_v20 = vld [vmem:[#allocation2 + $0xc4] ss:$24 sps:$4 sm:$0xff]   ;;  %v2413_v23 = vld [vmem:[#allocation2 + $0xc0] ss:$24 sps:$4 sm:$0xff]  }
  0x40   :  { %816 = vmatprep.subr.bf16.mxu0 %v2392_v8  ;;  %778 = vmatpush1.bf16.msra.mxu1 %v2395_v10  ;;  %v2408_v22 = vld [vmem:[#allocation2 + $0x98] ss:$24 sps:$4 sm:$0xff]   ;;  %v2417_v24 = vld [vmem:[#allocation2 + $0xf4] ss:$24 sps:$4 sm:$0xff]   ;;  %v2414_v26 = vld [vmem:[#allocation2 + $0xc8] ss:$24 sps:$4 sm:$0xff]   ;;  %v88_v8 = vlaneseq }
  0x41   :  { %779 = vmatprep.subr.bf16.mxu1 %v2399_v13  ;;  %v2416_v25 = vld [vmem:[#allocation2 + $0xcc] ss:$24 sps:$4 sm:$0xff]   ;;  %v2419_v27 = vld [vmem:[#allocation2 + $0xf0] ss:$24 sps:$4 sm:$0xff]   ;;  %v2422_v29 = vld [vmem:[#allocation2 + $0xfc] ss:$24 sps:$4 sm:$0xff]  }
  0x42   :  { %2037 = vmatmul.mubr.msk.bf16.vlgmr.msra.gmra.mrb[0].mxu0 %vm118_vm0, %v81_v7  ;;  %v2423_v28 = vld [vmem:[#allocation2 + $0x124] ss:$24 sps:$4 sm:$0xff]   ;;  %v2420_v30 = vld [vmem:[#allocation2 + $0xf8] ss:$24 sps:$4 sm:$0xff]   ;;  %v2429_v32 = vld [vmem:[#allocation2 + $0x154] ss:$24 sps:$4 sm:$0xff]  }
  0x43   :  { %817 = vmatpush1.bf16.msra.mxu0 %v2390_v11  ;;  %v2425_v31 = vld [vmem:[#allocation2 + $0x120] ss:$24 sps:$4 sm:$0xff]   ;;  %v2428_v33 = vld [vmem:[#allocation2 + $0x12c] ss:$24 sps:$4 sm:$0xff]   ;;  %v2431_v35 = vld [vmem:[#allocation2 + $0x150] ss:$24 sps:$4 sm:$0xff]  }
  0x44   :  { %818 = vmatprep.subr.bf16.mxu0 %v2398_v12  ;;  %780 = vmatpush1.bf16.msra.mxu1 %v2401_v15  ;;  %v2426_v34 = vld [vmem:[#allocation2 + $0x128] ss:$24 sps:$4 sm:$0xff]   ;;  %v2435_v36 = vld [vmem:[#allocation2 + $0x184] ss:$24 sps:$4 sm:$0xff]   ;;  %v2432_v38 = vld [vmem:[#allocation2 + $0x158] ss:$24 sps:$4 sm:$0xff]  }
  0x45   :  { %781 = vmatprep.subr.bf16.mxu1 %v2405_v16  ;;  %v2434_v37 = vld [vmem:[#allocation2 + $0x15c] ss:$24 sps:$4 sm:$0xff]   ;;  %v2437_v39 = vld [vmem:[#allocation2 + $0x180] ss:$24 sps:$4 sm:$0xff]   ;;  %v2440_v41 = vld [vmem:[#allocation2 + $0x18c] ss:$24 sps:$4 sm:$0xff]  }
  0x46   :  { %v2441_v40 = vld [vmem:[#allocation2 + $0x1b4] ss:$24 sps:$4 sm:$0xff]   ;;  %v2438_v42 = vld [vmem:[#allocation2 + $0x188] ss:$24 sps:$4 sm:$0xff]   ;;  %v2447_v44 = vld [vmem:[#allocation2 + $0x1e4] ss:$24 sps:$4 sm:$0xff]  }
  0x47   :  { %819 = vmatpush1.bf16.msra.mxu0 %v2396_v14  ;;  %v2443_v43 = vld [vmem:[#allocation2 + $0x1b0] ss:$24 sps:$4 sm:$0xff]   ;;  %v2446_v45 = vld [vmem:[#allocation2 + $0x1bc] ss:$24 sps:$4 sm:$0xff]   ;;  %v2449_v46 = vld [vmem:[#allocation2 + $0x1e0] ss:$24 sps:$4 sm:$0xff]  }
  0x48   :  { %820 = vmatprep.subr.bf16.mxu0 %v2404_v17  ;;  %782 = vmatpush1.bf16.msra.mxu1 %v2407_v19  ;;  %v2444_v47 = vld [vmem:[#allocation2 + $0x1b8] ss:$24 sps:$4 sm:$0xff]   ;;  %v2453_v48 = vld [vmem:[#allocation2 + $0x214] ss:$24 sps:$4 sm:$0xff]   ;;  %v2450_v51 = vld [vmem:[#allocation2 + $0x1e8] ss:$24 sps:$4 sm:$0xff]  }
  0x49   :  { %783 = vmatprep.subr.bf16.mxu1 %v2411_v20  ;;  %v2452_v49 = vld [vmem:[#allocation2 + $0x1ec] ss:$24 sps:$4 sm:$0xff]   ;;  %v2455_v50 = vld [vmem:[#allocation2 + $0x210] ss:$24 sps:$4 sm:$0xff]   ;;  %v2458_v53 = vld [vmem:[#allocation2 + $0x21c] ss:$24 sps:$4 sm:$0xff]  }
  0x4a   :  { %v2459_v52 = vld [vmem:[#allocation2 + $0x244] ss:$24 sps:$4 sm:$0xff]   ;;  %v2461_v54 = vld [vmem:[#allocation2 + $0x240] ss:$24 sps:$4 sm:$0xff]   ;;  %v2465_v56 = vld [vmem:[#allocation2 + $0x274] ss:$24 sps:$4 sm:$0xff]  }
  0x4b   :  { %821 = vmatpush1.bf16.msra.mxu0 %v2402_v18  ;;  %v2456_v55 = vld [vmem:[#allocation2 + $0x218] ss:$24 sps:$4 sm:$0xff]   ;;  %v2464_v57 = vld [vmem:[#allocation2 + $0x24c] ss:$24 sps:$4 sm:$0xff]   ;;  %v2462_v59 = vld [vmem:[#allocation2 + $0x248] ss:$24 sps:$4 sm:$0xff]  }
  0x4c   :  { %822 = vmatprep.subr.bf16.mxu0 %v2410_v21  ;;  %784 = vmatpush1.bf16.msra.mxu1 %v2413_v23  ;;  %v2467_v58 = vld [vmem:[#allocation2 + $0x270] ss:$24 sps:$4 sm:$0xff]   ;;  %v2470_v60 = vld [vmem:[#allocation2 + $0x27c] ss:$24 sps:$4 sm:$0xff]   ;;  %v2473_v63 = vld [vmem:[#allocation2 + $0x2a0] ss:$24 sps:$4 sm:$0xff]  }
  0x4d   :  { %785 = vmatprep.subr.bf16.mxu1 %v2417_v24  ;;  %v2468_v61 = vld [vmem:[#allocation2 + $0x278] ss:$24 sps:$4 sm:$0xff]   ;;  %v2471_v62 = vld [vmem:[#allocation2 + $0x2a4] ss:$24 sps:$4 sm:$0xff]   ;;  %v2474_v1 = vld [vmem:[#allocation2 + $0x2a8] ss:$24 sps:$4 sm:$0xff]  }
  0x4e   :  { %v2476_v0 = vld [vmem:[#allocation2 + $0x2ac] ss:$24 sps:$4 sm:$0xff]   ;;  %v2479_v3 = vld [vmem:[#allocation2 + $0x2d0] ss:$24 sps:$4 sm:$0xff]   ;;  %v2482_v4 = vld [vmem:[#allocation2 + $0x2dc] ss:$24 sps:$4 sm:$0xff]  }
  0x4f   :  { %823 = vmatpush1.bf16.msra.mxu0 %v2408_v22  ;;  %v2477_v2 = vld [vmem:[#allocation2 + $0x2d4] ss:$24 sps:$4 sm:$0xff]   ;;  %v2480_v5 = vld [vmem:[#allocation2 + $0x2d8] ss:$24 sps:$4 sm:$0xff]   ;;  %v2531_v7 = vld [vmem:[#allocation7 + $0x40] sm:$0xff]   ;;  %v2884_v9 = vshrl.u32 %v88_v8, 7 }
  0x50   :  { %824 = vmatprep.subr.bf16.mxu0 %v2416_v25  ;;  %786 = vmatpush1.bf16.msra.mxu1 %v2419_v27  ;;  %v2485_v6 = vld [vmem:[#allocation2 + $0x14] ss:$24 sps:$4 sm:$0xff]   ;;  %v86_v11 = vld [vmem:[%s2984_s4] sm:$0x3]  ;;  %v2483_v25 = vld [vmem:[#allocation2 + $0x10] ss:$24 sps:$4 sm:$0xff]  }
  0x51   :  { %787 = vmatprep.subr.bf16.mxu1 %v2423_v28  ;;  %v90_v10 = vsub.s32 0, %v2884_v9  ;;  %v94_v12 = vsub.s32 1, %v2884_v9  ;;  %v2898_v23 = vld [vmem:[%s2981_s1] sm:$0xff]  ;;  %vm1991_vm2 = vcmask 0  }
  0x52   :  { %v2488_v27 = vld [vmem:[#allocation2 + $0x44] ss:$24 sps:$4 sm:$0xff]  }
  0x53   :  { %825 = vmatpush1.bf16.msra.mxu0 %v2414_v26  ;;  %v91_v13 = vrot.slane %v86_v11, %v90_v10  ;;  %v95_v14 = vrot.slane %v86_v11, %v94_v12  ;;  %v2532_v28 = vld [vmem:[#allocation7] sm:$0xff]   ;;  %v2558_v11 = vld [vmem:[#allocation7 + $0x90] sm:$0xff]  }
  0x54   :  { %826 = vmatprep.subr.bf16.mxu0 %v2422_v29  ;;  %788 = vmatpush1.bf16.msra.mxu1 %v2425_v31  ;;  %v2533_v29 = vld [vmem:[#allocation7 + $0x48] sm:$0xff]   ;;  %v2486_v31 = vld [vmem:[#allocation2 + $0x40] ss:$24 sps:$4 sm:$0xff]  }
  0x55   :  { %789 = vmatprep.subr.bf16.mxu1 %v2429_v32  ;;  %v2491_v32 = vld [vmem:[#allocation2 + $0x74] ss:$24 sps:$4 sm:$0xff]  }
  0x57   :  { %827 = vmatpush1.bf16.msra.mxu0 %v2420_v30  ;;  %v2135_v30 = vcombine.high %v2898_v23, %v2898_v23 }
  0x58   :  { %828 = vmatprep.subr.bf16.mxu0 %v2428_v33  ;;  %790 = vmatpush1.bf16.msra.mxu1 %v2431_v35  ;;  %v2534_v33 = vld [vmem:[#allocation7 + $0x8] sm:$0xff]  }
  0x59   :  { %791 = vmatprep.subr.bf16.mxu1 %v2435_v36  ;;  %v2489_v35 = vld [vmem:[#allocation2 + $0x70] ss:$24 sps:$4 sm:$0xff]   ;;  %v2494_v36 = vld [vmem:[#allocation2 + $0xa4] ss:$24 sps:$4 sm:$0xff]  }
  0x5b   :  { %829 = vmatpush1.bf16.msra.mxu0 %v2426_v34  ;;  %v2535_v34 = vld [vmem:[#allocation7 + $0x50] sm:$0xff]  }
  0x5c   :  { %830 = vmatprep.subr.bf16.mxu0 %v2434_v37  ;;  %792 = vmatpush1.bf16.msra.mxu1 %v2437_v39  ;;  %v2536_v37 = vld [vmem:[#allocation7 + $0x10] sm:$0xff]   ;;  %v2492_v39 = vld [vmem:[#allocation2 + $0xa0] ss:$24 sps:$4 sm:$0xff]  }
  0x5d   :  { %793 = vmatprep.subr.bf16.mxu1 %v2441_v40  ;;  %v2497_v40 = vld [vmem:[#allocation2 + $0xd4] ss:$24 sps:$4 sm:$0xff]  }
  0x5f   :  { %831 = vmatpush1.bf16.msra.mxu0 %v2432_v38  ;;  %v2537_v38 = vld [vmem:[#allocation7 + $0x58] sm:$0xff]  }
  0x60   :  { %832 = vmatprep.subr.bf16.mxu0 %v2440_v41  ;;  %794 = vmatpush1.bf16.msra.mxu1 %v2443_v43  ;;  %v2538_v41 = vld [vmem:[#allocation7 + $0x18] sm:$0xff]   ;;  %v2495_v43 = vld [vmem:[#allocation2 + $0xd0] ss:$24 sps:$4 sm:$0xff]  }
  0x61   :  { %795 = vmatprep.subr.bf16.mxu1 %v2447_v44  ;;  %v2500_v44 = vld [vmem:[#allocation2 + $0x104] ss:$24 sps:$4 sm:$0xff]  }
  0x63   :  { %833 = vmatpush1.bf16.msra.mxu0 %v2438_v42  ;;  %v2539_v42 = vld [vmem:[#allocation7 + $0x60] sm:$0xff]  }
  0x64   :  { %834 = vmatprep.subr.bf16.mxu0 %v2446_v45  ;;  %796 = vmatpush1.bf16.msra.mxu1 %v2449_v46  ;;  %v2540_v45 = vld [vmem:[#allocation7 + $0x20] sm:$0xff]   ;;  %v2541_v46 = vld [vmem:[#allocation7 + $0x68] sm:$0xff]  }
  0x65   :  { %797 = vmatprep.subr.bf16.mxu1 %v2453_v48  ;;  %v2503_v48 = vld [vmem:[#allocation2 + $0x134] ss:$24 sps:$4 sm:$0xff]  }
  0x67   :  { %835 = vmatpush1.bf16.msra.mxu0 %v2444_v47  ;;  %v2498_v47 = vld [vmem:[#allocation2 + $0x100] ss:$24 sps:$4 sm:$0xff]  }
  0x68   :  { %836 = vmatprep.subr.bf16.mxu0 %v2452_v49  ;;  %798 = vmatpush1.bf16.msra.mxu1 %v2455_v50  ;;  %v2542_v49 = vld [vmem:[#allocation7 + $0x28] sm:$0xff]   ;;  %v2543_v50 = vld [vmem:[#allocation7 + $0x70] sm:$0xff]  }
  0x69   :  { %799 = vmatprep.subr.bf16.mxu1 %v2459_v52  ;;  %v2506_v52 = vld [vmem:[#allocation2 + $0x164] ss:$24 sps:$4 sm:$0xff]  }
  0x6b   :  { %837 = vmatpush1.bf16.msra.mxu0 %v2450_v51  ;;  %v2501_v51 = vld [vmem:[#allocation2 + $0x130] ss:$24 sps:$4 sm:$0xff]  }
  0x6c   :  { %838 = vmatprep.subr.bf16.mxu0 %v2458_v53  ;;  %800 = vmatpush1.bf16.msra.mxu1 %v2461_v54  ;;  %v2544_v53 = vld [vmem:[#allocation7 + $0x30] sm:$0xff]   ;;  %v2545_v54 = vld [vmem:[#allocation7 + $0x78] sm:$0xff]  }
  0x6d   :  { %801 = vmatprep.subr.bf16.mxu1 %v2465_v56  ;;  %v2509_v56 = vld [vmem:[#allocation2 + $0x194] ss:$24 sps:$4 sm:$0xff]  }
  0x6f   :  { %839 = vmatpush1.bf16.msra.mxu0 %v2456_v55  ;;  %v2504_v55 = vld [vmem:[#allocation2 + $0x160] ss:$24 sps:$4 sm:$0xff]  }
  0x70   :  { %840 = vmatprep.subr.bf16.mxu0 %v2464_v57  ;;  %802 = vmatpush1.bf16.msra.mxu1 %v2467_v58  ;;  %v2546_v57 = vld [vmem:[#allocation7 + $0x38] sm:$0xff]   ;;  %v2549_v58 = vld [vmem:[#allocation7 + $0xc0] sm:$0xff]  }
  0x71   :  { %803 = vmatprep.subr.bf16.mxu1 %v2471_v62  ;;  %v2512_v62 = vld [vmem:[#allocation2 + $0x1c4] ss:$24 sps:$4 sm:$0xff]  }
  0x73   :  { %841 = vmatpush1.bf16.msra.mxu0 %v2462_v59  ;;  %v2909_v59 = vld [vmem:[%s2981_s1 + $0x8] sm:$0xff] }
  0x74   :  { %842 = vmatprep.subr.bf16.mxu0 %v2470_v60  ;;  %804 = vmatpush1.bf16.msra.mxu1 %v2473_v63  ;;  %v2507_v60 = vld [vmem:[#allocation2 + $0x190] ss:$24 sps:$4 sm:$0xff]   ;;  %v2550_v63 = vld [vmem:[#allocation7 + $0x80] sm:$0xff]  }
  0x75   :  { %805 = vmatprep.subr.bf16.mxu1 %v2477_v2  ;;  %v2510_v2 = vld [vmem:[#allocation2 + $0x1c0] ss:$24 sps:$4 sm:$0xff]  }
  0x77   :  { %843 = vmatpush1.bf16.msra.mxu0 %v2468_v61  ;;  %v2134_v61 = vcombine.low %v2898_v23, %v2898_v23  ;;  %v2527_v23 = vld [vmem:[#allocation2 + $0x2b4] ss:$24 sps:$4 sm:$0xff]  }
  0x78   :  { %844 = vmatprep.subr.bf16.mxu0 %v2476_v0  ;;  %806 = vmatpush1.bf16.msra.mxu1 %v2479_v3  ;;  %v2553_v0 = vld [vmem:[#allocation7 + $0xc8] sm:$0xff]  }
  0x79   :  { %857 = vmatprep.subr.bf16.mxu1 %v2485_v6  ;;  %v2515_v3 = vld [vmem:[#allocation2 + $0x1f4] ss:$24 sps:$4 sm:$0xff]   ;;  %v2513_v6 = vld [vmem:[#allocation2 + $0x1f0] ss:$24 sps:$4 sm:$0xff]  }
  0x7b   :  { %845 = vmatpush1.bf16.msra.mxu0 %v2474_v1  ;;  %v2137_v1 = vcombine.high %v2909_v59, %v2909_v59 }
  0x7c   :  { %846 = vmatprep.subr.bf16.mxu0 %v2482_v4  ;;  %v2554_v4 = vld [vmem:[#allocation7 + $0x88] sm:$0xff]  }
  0x7f   :  { %847 = vmatpush1.bf16.msra.mxu0 %v2480_v5  ;;  %v2557_v5 = vld [vmem:[#allocation7 + $0xd0] sm:$0xff]  }
  0x80   :  { %2237 = vmatprep.subr.bf16.mxu0 %v2531_v7  ;;  %v2518_v7 = vld [vmem:[#allocation2 + $0x224] ss:$24 sps:$4 sm:$0xff]  }
 0x115   :  { %v156_v15 = vpop.f32.mrb[0].mxu0 }
 0x116   :  { %v157_v16 = vadd.f32 %v156_v15, %v91_v13  ;;  %v158_v17 = vpop.f32.mrb[1].mxu0  ;;  %v2561_v13 = vld [vmem:[#allocation7 + $0xd8] sm:$0xff]   ;;  %v2521_v15 = vld [vmem:[#allocation2 + $0x254] ss:$24 sps:$4 sm:$0xff]  }
 0x117   :  { %v159_v18 = vadd.f32 %v158_v17, %v95_v14  ;;  %v160_v19 = vpop.f32.mrb[2].mxu0  ;;  %v2516_v14 = vld [vmem:[#allocation2 + $0x220] ss:$24 sps:$4 sm:$0xff]  }
 0x118   :  { %v163_v20 = vmax.f32 %v157_v16, 0.0  ;;  %v161_v21 = vpop.f32.mrb[3].mxu0  ;;  %v2562_v16 = vld [vmem:[#allocation7 + $0x98] sm:$0xff]   ;;  %v2565_v17 = vld [vmem:[#allocation7 + $0xe0] sm:$0xff]  }
 0x119   :  { %v164_v22 = vmax.f32 %v159_v18, 0.0  ;;  %v2519_v18 = vld [vmem:[#allocation2 + $0x250] ss:$24 sps:$4 sm:$0xff]   ;;  %v2524_v19 = vld [vmem:[#allocation2 + $0x284] ss:$24 sps:$4 sm:$0xff]  }
 0x11a   :  { %v2900_v26 = vpack.c.bf16 %v163_v20, %v163_v20  ;;  %v2566_v20 = vld [vmem:[#allocation7 + $0xa0] sm:$0xff]   ;;  %v2569_v21 = vld [vmem:[#allocation7 + $0xe8] sm:$0xff]  }
 0x11b   :  { %v166_v24 = vpack.c.bf16 %v164_v22, %v164_v22  ;;  %v2522_v22 = vld [vmem:[#allocation2 + $0x280] ss:$24 sps:$4 sm:$0xff]  }
 0x11d   :  { %807 = vmatprep.mubr.bf16.mxu1 %v166_v24  ;;  %848 = vmatprep.mubr.bf16.mxu0 %v166_v24 }
 0x11e   :  { %808 = vmatmul.mubr.bf16.vlgmr.msra.gmra.mrb[0].mxu1 %v2900_v26  ;;  %849 = vmatmul.mubr.bf16.vlgmr.msra.gmra.mrb[4].mxu0 %v2900_v26 }
 0x11f   :  { %858 = vmatpush1.bf16.msra.mxu1 %v2483_v25  ;;  %889 = vmatprep.mubr.bf16.mxu1 %v166_v24  ;;  %v2570_v24 = vld [vmem:[#allocation7 + $0xa8] sm:$0xff]   ;;  %v2573_v25 = vld [vmem:[#allocation7 + $0xf0] sm:$0xff]  }
 0x120   :  { %859 = vmatprep.subr.bf16.mxu1 %v2488_v27  ;;  %2238 = vmatpush3.bf16.msra.mxu0 %v2532_v28  ;;  %v2525_v27 = vld [vmem:[#allocation2 + $0x2b0] ss:$24 sps:$4 sm:$0xff]   ;;  %v2530_v28 = vld [vmem:[#allocation2 + $0x2e4] ss:$24 sps:$4 sm:$0xff]  }
 0x121   :  { %2239 = vmatprep.subr.bf16.mxu0 %v2533_v29  ;;  %1446 = vmatprep.mubr.bf16.mxu0 %v2135_v30  ;;  %v2574_v29 = vld [vmem:[#allocation7 + $0xb0] sm:$0xff]   ;;  %v2577_v30 = vld [vmem:[#allocation7 + $0xf8] sm:$0xff]  }
 0x123   :  { %860 = vmatpush1.bf16.msra.mxu1 %v2486_v31  ;;  %v2528_v31 = vld [vmem:[#allocation2 + $0x2e0] ss:$24 sps:$4 sm:$0xff]  }
 0x124   :  { %861 = vmatprep.subr.bf16.mxu1 %v2491_v32  ;;  %2240 = vmatpush3.bf16.msra.mxu0 %v2534_v33  ;;  %v2551_v32 = vld [vmem:[#allocation7 + $0x140] sm:$0xff]   ;;  %v2578_v33 = vld [vmem:[#allocation7 + $0xb8] sm:$0xff]  }
 0x125   :  { %2241 = vmatprep.subr.bf16.mxu0 %v2535_v34  ;;  %v2918_v34 = vld [vmem:[%s2981_s1 + $0x10] sm:$0xff] }
 0x127   :  { %862 = vmatpush1.bf16.msra.mxu1 %v2489_v35  ;;  %v2585_v35 = vld [vmem:[#allocation5 + $0x40] sm:$0xff]  }
 0x128   :  { %863 = vmatprep.subr.bf16.mxu1 %v2494_v36  ;;  %2242 = vmatpush3.bf16.msra.mxu0 %v2536_v37  ;;  %v2552_v36 = vld [vmem:[#allocation7 + $0x100] sm:$0xff]   ;;  %v2136_v37 = vcombine.low %v2909_v59, %v2909_v59  ;;  %v2607_v59 = vld [vmem:[#allocation5 + $0x28] sm:$0xff]  }
 0x129   :  { %2243 = vmatprep.subr.bf16.mxu0 %v2537_v38  ;;  %v2555_v38 = vld [vmem:[#allocation7 + $0x148] sm:$0xff]  }
 0x12b   :  { %864 = vmatpush1.bf16.msra.mxu1 %v2492_v39  ;;  %v2139_v39 = vcombine.high %v2918_v34, %v2918_v34 }
 0x12c   :  { %865 = vmatprep.subr.bf16.mxu1 %v2497_v40  ;;  %2244 = vmatpush3.bf16.msra.mxu0 %v2538_v41  ;;  %v2587_v40 = vld [vmem:[#allocation5] sm:$0xff]   ;;  %v2589_v41 = vld [vmem:[#allocation5 + $0x48] sm:$0xff]  }
 0x12d   :  { %2245 = vmatprep.subr.bf16.mxu0 %v2539_v42  ;;  %v2556_v42 = vld [vmem:[#allocation7 + $0x108] sm:$0xff]  }
 0x12f   :  { %866 = vmatpush1.bf16.msra.mxu1 %v2495_v43  ;;  %v2559_v43 = vld [vmem:[#allocation7 + $0x150] sm:$0xff]  }
 0x130   :  { %867 = vmatprep.subr.bf16.mxu1 %v2500_v44  ;;  %2246 = vmatpush3.bf16.msra.mxu0 %v2540_v45  ;;  %v2591_v44 = vld [vmem:[#allocation5 + $0x8] sm:$0xff]   ;;  %v2593_v45 = vld [vmem:[#allocation5 + $0x50] sm:$0xff]  }
 0x131   :  { %2247 = vmatprep.subr.bf16.mxu0 %v2541_v46  ;;  %v2560_v46 = vld [vmem:[#allocation7 + $0x110] sm:$0xff]  }
 0x133   :  { %868 = vmatpush1.bf16.msra.mxu1 %v2498_v47  ;;  %v2563_v47 = vld [vmem:[#allocation7 + $0x158] sm:$0xff]  }
 0x134   :  { %869 = vmatprep.subr.bf16.mxu1 %v2503_v48  ;;  %2248 = vmatpush3.bf16.msra.mxu0 %v2542_v49  ;;  %v2595_v48 = vld [vmem:[#allocation5 + $0x10] sm:$0xff]   ;;  %v2597_v49 = vld [vmem:[#allocation5 + $0x58] sm:$0xff]  }
 0x135   :  { %2249 = vmatprep.subr.bf16.mxu0 %v2543_v50  ;;  %v2567_v50 = vld [vmem:[#allocation7 + $0x160] sm:$0xff]  }
 0x137   :  { %870 = vmatpush1.bf16.msra.mxu1 %v2501_v51  ;;  %v2599_v51 = vld [vmem:[#allocation5 + $0x18] sm:$0xff]  }
 0x138   :  { %871 = vmatprep.subr.bf16.mxu1 %v2506_v52  ;;  %2250 = vmatpush3.bf16.msra.mxu0 %v2544_v53  ;;  %v2601_v52 = vld [vmem:[#allocation5 + $0x60] sm:$0xff]  }
 0x139   :  { %2251 = vmatprep.subr.bf16.mxu0 %v2545_v54  ;;  %v2568_v53 = vld [vmem:[#allocation7 + $0x120] sm:$0xff]   ;;  %v2571_v54 = vld [vmem:[#allocation7 + $0x168] sm:$0xff]  }
 0x13b   :  { %872 = vmatpush1.bf16.msra.mxu1 %v2504_v55  ;;  %v2603_v55 = vld [vmem:[#allocation5 + $0x20] sm:$0xff]  }
 0x13c   :  { %873 = vmatprep.subr.bf16.mxu1 %v2509_v56  ;;  %2252 = vmatpush3.bf16.msra.mxu0 %v2546_v57  ;;  %v2605_v56 = vld [vmem:[#allocation5 + $0x68] sm:$0xff]  }
 0x13d   :  { %2259 = vmatprep.subr.bf16.mxu0 %v2549_v58  ;;  %v2572_v57 = vld [vmem:[#allocation7 + $0x128] sm:$0xff]   ;;  %v2575_v58 = vld [vmem:[#allocation7 + $0x170] sm:$0xff]  }
 0x13f   :  { %874 = vmatpush1.bf16.msra.mxu1 %v2507_v60  ;;  %1447 = vmatmul.mubr.bf16.vlgmr.msra.gmra.mrb[8].mxu0 %v2134_v61  ;;  %v2609_v60 = vld [vmem:[#allocation5 + $0x70] sm:$0xff]  }
 0x140   :  { %875 = vmatprep.subr.bf16.mxu1 %v2512_v62  ;;  %2260 = vmatpush3.bf16.msra.mxu0 %v2550_v63  ;;  %v2576_v61 = vld [vmem:[#allocation7 + $0x130] sm:$0xff]   ;;  %v2579_v62 = vld [vmem:[#allocation7 + $0x178] sm:$0xff]  }
 0x141   :  { %2261 = vmatprep.subr.bf16.mxu0 %v2553_v0  ;;  %1486 = vmatprep.mubr.bf16.mxu0 %v2137_v1  ;;  %v2611_v63 = vld [vmem:[#allocation5 + $0x30] sm:$0xff]   ;;  %v2613_v0 = vld [vmem:[#allocation5 + $0x78] sm:$0xff]  }
 0x142   :  { %v2580_v1 = vld [vmem:[#allocation7 + $0x138] sm:$0xff]  }
 0x143   :  { %876 = vmatpush1.bf16.msra.mxu1 %v2510_v2  ;;  %v2586_v2 = vld [vmem:[#allocation5 + $0xc0] sm:$0xff]  }
 0x144   :  { %877 = vmatprep.subr.bf16.mxu1 %v2515_v3  ;;  %2262 = vmatpush3.bf16.msra.mxu0 %v2554_v4  ;;  %v2615_v3 = vld [vmem:[#allocation5 + $0x38] sm:$0xff]   ;;  %v2138_v4 = vcombine.low %v2918_v34, %v2918_v34 }
 0x145   :  { %2263 = vmatprep.subr.bf16.mxu0 %v2557_v5  ;;  %v2617_v5 = vld [vmem:[#allocation5 + $0x140] sm:$0xff]  }
 0x147   :  { %878 = vmatpush1.bf16.msra.mxu1 %v2513_v6  ;;  %v2588_v6 = vld [vmem:[#allocation5 + $0x80] sm:$0xff]  }
 0x148   :  { %879 = vmatprep.subr.bf16.mxu1 %v2518_v7  ;;  %2264 = vmatpush3.bf16.msra.mxu0 %v2558_v11  ;;  %v2590_v7 = vld [vmem:[#allocation5 + $0xc8] sm:$0xff]  }
 0x149   :  { %2265 = vmatprep.subr.bf16.mxu0 %v2561_v13  ;;  %v2592_v11 = vld [vmem:[#allocation5 + $0x88] sm:$0xff]   ;;  %v2594_v13 = vld [vmem:[#allocation5 + $0xd0] sm:$0xff]  }
 0x14b   :  { %880 = vmatpush1.bf16.msra.mxu1 %v2516_v14  ;;  %v2596_v14 = vld [vmem:[#allocation5 + $0x90] sm:$0xff]  }
 0x14c   :  { %881 = vmatprep.subr.bf16.mxu1 %v2521_v15  ;;  %2266 = vmatpush3.bf16.msra.mxu0 %v2562_v16  ;;  %v2598_v15 = vld [vmem:[#allocation5 + $0xd8] sm:$0xff]  }
 0x14d   :  { %2267 = vmatprep.subr.bf16.mxu0 %v2565_v17  ;;  %v2600_v16 = vld [vmem:[#allocation5 + $0x98] sm:$0xff]   ;;  %v2602_v17 = vld [vmem:[#allocation5 + $0xe0] sm:$0xff]  }
 0x14f   :  { %882 = vmatpush1.bf16.msra.mxu1 %v2519_v18  ;;  %v2604_v18 = vld [vmem:[#allocation5 + $0xa0] sm:$0xff]  }
 0x150   :  { %883 = vmatprep.subr.bf16.mxu1 %v2524_v19  ;;  %2268 = vmatpush3.bf16.msra.mxu0 %v2566_v20  ;;  %v2606_v19 = vld [vmem:[#allocation5 + $0xe8] sm:$0xff]  }
 0x151   :  { %2269 = vmatprep.subr.bf16.mxu0 %v2569_v21  ;;  %v2608_v20 = vld [vmem:[#allocation5 + $0xa8] sm:$0xff]   ;;  %v2610_v21 = vld [vmem:[#allocation5 + $0xf0] sm:$0xff]  }
 0x153   :  { %884 = vmatpush1.bf16.msra.mxu1 %v2522_v22  ;;  %v2612_v22 = vld [vmem:[#allocation5 + $0xb0] sm:$0xff]  }
 0x154   :  { %885 = vmatprep.subr.bf16.mxu1 %v2527_v23  ;;  %2270 = vmatpush3.bf16.msra.mxu0 %v2570_v24  ;;  %v2614_v23 = vld [vmem:[#allocation5 + $0xf8] sm:$0xff]  }
 0x155   :  { %2271 = vmatprep.subr.bf16.mxu0 %v2573_v25  ;;  %v2616_v24 = vld [vmem:[#allocation5 + $0xb8] sm:$0xff]   ;;  %v275_v25 = vsub.s32 2, %v2884_v9 }
 0x157   :  { %886 = vmatpush1.bf16.msra.mxu1 %v2525_v27  ;;  %v2931_v27 = vld [vmem:[%s2986_s6] sm:$0x3f] }
 0x158   :  { %887 = vmatprep.subr.bf16.mxu1 %v2530_v28  ;;  %2272 = vmatpush3.bf16.msra.mxu0 %v2574_v29  ;;  %v279_v28 = vsub.s32 3, %v2884_v9  ;;  %v268_v29 = vrot.slane %v2931_v27, %v90_v10 }
 0x159   :  { %2273 = vmatprep.subr.bf16.mxu0 %v2577_v30  ;;  %v276_v30 = vrot.slane %v2931_v27, %v275_v25 }
 0x15b   :  { %888 = vmatpush1.bf16.msra.mxu1 %v2528_v31  ;;  %v272_v31 = vrot.slane %v2931_v27, %v94_v12 }
 0x15c   :  { %2281 = vmatprep.subr.bf16.mxu1 %v2551_v32  ;;  %2274 = vmatpush3.bf16.msra.mxu0 %v2578_v33  ;;  %v280_v32 = vrot.slane %v2931_v27, %v279_v28 }
 0x15d   :  { %2303 = vmatprep.subr.bf16.mxu0 %v2585_v35 }
 0x15e   :  { %890 = vmatmul.mubr.bf16.vlgmr.msra.gmra.mrb[4].mxu1 %v2900_v26  ;;  %v2564_v26 = vld [vmem:[#allocation7 + $0x118] sm:$0xff]  }
 0x15f   :  { %2282 = vmatpush3.bf16.msra.mxu1 %v2552_v36  ;;  %1487 = vmatmul.mubr.bf16.vlgmr.msra.gmra.mrb[12].mxu0 %v2136_v37 }
 0x160   :  { %2283 = vmatprep.subr.bf16.mxu1 %v2555_v38  ;;  %1526 = vmatprep.mubr.bf16.mxu1 %v2139_v39 }
 0x161   :  { %2304 = vmatpush3.bf16.msra.mxu0 %v2587_v40 }
 0x162   :  { %2305 = vmatprep.subr.bf16.mxu0 %v2589_v41 }
 0x163   :  { %2284 = vmatpush3.bf16.msra.mxu1 %v2556_v42 }
 0x164   :  { %2285 = vmatprep.subr.bf16.mxu1 %v2559_v43 }
 0x165   :  { %2306 = vmatpush3.bf16.msra.mxu0 %v2591_v44 }
 0x166   :  { %2307 = vmatprep.subr.bf16.mxu0 %v2593_v45 }
 0x167   :  { %2286 = vmatpush3.bf16.msra.mxu1 %v2560_v46 }
 0x168   :  { %2287 = vmatprep.subr.bf16.mxu1 %v2563_v47 }
 0x169   :  { %2308 = vmatpush3.bf16.msra.mxu0 %v2595_v48 }
 0x16a   :  { %2309 = vmatprep.subr.bf16.mxu0 %v2597_v49  ;;  %v2618_v49 = vld [vmem:[#allocation5 + $0x100] sm:$0xff]  }
 0x16b   :  { %2288 = vmatpush3.bf16.msra.mxu1 %v2564_v26 }
 0x16c   :  { %2289 = vmatprep.subr.bf16.mxu1 %v2567_v50 }
 0x16d   :  { %2310 = vmatpush3.bf16.msra.mxu0 %v2599_v51  ;;  %v2619_v51 = vld [vmem:[#allocation5 + $0x148] sm:$0xff]  }
 0x16e   :  { %2311 = vmatprep.subr.bf16.mxu0 %v2601_v52  ;;  %v2620_v52 = vld [vmem:[#allocation5 + $0x108] sm:$0xff]  }
 0x16f   :  { %2290 = vmatpush3.bf16.msra.mxu1 %v2568_v53  ;;  %v2621_v53 = vld [vmem:[#allocation5 + $0x150] sm:$0xff]  }
 0x170   :  { %2291 = vmatprep.subr.bf16.mxu1 %v2571_v54  ;;  %v2622_v54 = vld [vmem:[#allocation5 + $0x110] sm:$0xff]  }
 0x171   :  { %2312 = vmatpush3.bf16.msra.mxu0 %v2603_v55  ;;  %v2623_v55 = vld [vmem:[#allocation5 + $0x158] sm:$0xff]  }
 0x172   :  { %2313 = vmatprep.subr.bf16.mxu0 %v2605_v56  ;;  %v2624_v56 = vld [vmem:[#allocation5 + $0x118] sm:$0xff]  }
 0x173   :  { %2292 = vmatpush3.bf16.msra.mxu1 %v2572_v57  ;;  %v2625_v57 = vld [vmem:[#allocation5 + $0x160] sm:$0xff]  }
 0x174   :  { %2293 = vmatprep.subr.bf16.mxu1 %v2575_v58  ;;  %v2626_v58 = vld [vmem:[#allocation5 + $0x120] sm:$0xff]  }
 0x175   :  { %2314 = vmatpush3.bf16.msra.mxu0 %v2607_v59  ;;  %v2627_v59 = vld [vmem:[#allocation5 + $0x168] sm:$0xff]  }
 0x176   :  { %2315 = vmatprep.subr.bf16.mxu0 %v2609_v60  ;;  %v2628_v60 = vld [vmem:[#allocation5 + $0x128] sm:$0xff]  }
 0x177   :  { %2294 = vmatpush3.bf16.msra.mxu1 %v2576_v61  ;;  %v2629_v61 = vld [vmem:[#allocation5 + $0x170] sm:$0xff]  }
 0x178   :  { %2295 = vmatprep.subr.bf16.mxu1 %v2579_v62  ;;  %v2630_v62 = vld [vmem:[#allocation5 + $0x130] sm:$0xff]  }
 0x179   :  { %2316 = vmatpush3.bf16.msra.mxu0 %v2611_v63  ;;  %v2631_v63 = vld [vmem:[#allocation5 + $0x178] sm:$0xff]  }
 0x17a   :  { %2317 = vmatprep.subr.bf16.mxu0 %v2613_v0 }
 0x17b   :  { %2296 = vmatpush3.bf16.msra.mxu1 %v2580_v1  ;;  %v2632_v1 = vld [vmem:[#allocation5 + $0x138] sm:$0xff]  }
 0x17c   :  { %2325 = vmatprep.subr.bf16.mxu1 %v2586_v2 }
 0x17d   :  { %2318 = vmatpush3.bf16.msra.mxu0 %v2615_v3 }
 0x17e   :  { %1527 = vmatmul.mubr.bf16.vlgmr.msra.gmra.mrb[8].mxu1 %v2138_v4  ;;  %2347 = vmatprep.subr.bf16.mxu0 %v2617_v5 }
 0x17f   :  { %2326 = vmatpush3.bf16.msra.mxu1 %v2588_v6  ;;  %v283_v6 = vsub.s32 4, %v2884_v9 }
 0x180   :  { %2327 = vmatprep.subr.bf16.mxu1 %v2590_v7  ;;  %v287_v7 = vsub.s32 5, %v2884_v9 }
 0x183   :  { %2328 = vmatpush3.bf16.msra.mxu1 %v2592_v11  ;;  %v284_v11 = vrot.slane %v2931_v27, %v283_v6 }
 0x184   :  { %2329 = vmatprep.subr.bf16.mxu1 %v2594_v13  ;;  %v288_v13 = vrot.slane %v2931_v27, %v287_v7 }
 0x187   :  { %2330 = vmatpush3.bf16.msra.mxu1 %v2596_v14 }
 0x188   :  { %2331 = vmatprep.subr.bf16.mxu1 %v2598_v15 }
 0x18b   :  { %2332 = vmatpush3.bf16.msra.mxu1 %v2600_v16 }
 0x18c   :  { %2333 = vmatprep.subr.bf16.mxu1 %v2602_v17 }
 0x18f   :  { %2334 = vmatpush3.bf16.msra.mxu1 %v2604_v18 }
 0x190   :  { %2335 = vmatprep.subr.bf16.mxu1 %v2606_v19 }
 0x193   :  { %2336 = vmatpush3.bf16.msra.mxu1 %v2608_v20 }
 0x194   :  { %2337 = vmatprep.subr.bf16.mxu1 %v2610_v21 }
 0x197   :  { %2338 = vmatpush3.bf16.msra.mxu1 %v2612_v22 }
 0x198   :  { %2339 = vmatprep.subr.bf16.mxu1 %v2614_v23 }
 0x19b   :  { %2340 = vmatpush3.bf16.msra.mxu1 %v2616_v24 }
 0x1f1   :  { %v809_v33 = vpop.f32.mrb[0].mxu1  ;;  %v850_v34 = vpop.f32.mrb[4].mxu0 }
 0x1f2   :  { %v810_v35 = vadd.f32 %v809_v33, %v268_v29  ;;  %v851_v36 = vadd.f32 %v850_v34, %v276_v30  ;;  %v811_v37 = vpop.f32.mrb[1].mxu1  ;;  %v852_v38 = vpop.f32.mrb[5].mxu0 }
 0x1f3   :  { %v812_v39 = vadd.f32 %v811_v37, %v272_v31  ;;  %v853_v40 = vadd.f32 %v852_v38, %v280_v32  ;;  %v813_v41 = vpop.f32.mrb[2].mxu1  ;;  %v854_v42 = vpop.f32.mrb[6].mxu0 }
 0x1f4   :  { %v898_v43 = vmax.f32 %v810_v35, 0.0  ;;  %v900_v10 = vmax.f32 %v851_v36, 0.0  ;;  %v814_v44 = vpop.f32.mrb[3].mxu1  ;;  %v855_v45 = vpop.f32.mrb[7].mxu0 }
 0x1f5   :  { %v899_v46 = vmax.f32 %v812_v39, 0.0  ;;  %v901_v47 = vmax.f32 %v853_v40, 0.0 }
 0x1f6   :  { %v904_v26 = vpack.c.bf16 %v898_v43, %v898_v43  ;;  %v906_v50 = vpack.c.bf16 %v900_v10, %v900_v10 }
 0x1f7   :  { %v905_v48 = vpack.c.bf16 %v899_v46, %v899_v46  ;;  %v907_v12 = vpack.c.bf16 %v901_v47, %v901_v47 }
 0x1f9   :  { %1854 = vmatprep.mubr.bf16.mxu0 %v905_v48  ;;  %1894 = vmatprep.mubr.bf16.mxu1 %v907_v12 }
 0x1fa   :  { %1855 = vmatmul.mubr.bf16.vlgmr.msra.gmra.mrb[16].mxu0 %v904_v26  ;;  %1895 = vmatmul.mubr.bf16.vlgmr.msra.gmra.mrb[12].mxu1 %v906_v50  ;;  %v2236_v26 = vld [vmem:[%s2989_s9] ss:$0 sm:$0xff]  ;;  %s2764_s9 = smov [#allocation8]  }
 0x1fb   :  { %2348 = vmatpush3.bf16.msra.mxu0 %v2618_v49  ;;  %s2009_s19 = sshll.u32 %s2764_s9, 4  ;;  %s2010_s19 = int_to_ptr.vmem [resolvable:$true] %s2009_s19 }
 0x1fc   :  { %2349 = vmatprep.subr.bf16.mxu0 %v2619_v51  ;;  %p2708_p11 = scmp.lt.s32.totalorder %s2010_s19, %s2010_s19 }
 0x1ff   :  { %2350 = vmatpush3.bf16.msra.mxu0 %v2620_v52 }
 0x200   :  { %2351 = vmatprep.subr.bf16.mxu0 %v2621_v53  ;;  %v1963_v53 = vld [vmem:[%s2982_s2] sm:$0xff]  ;;  %s2703_s2 = scalar_lea.vmem %s2010_s19, 128 }
 0x201   :  { %p2704_p10 = scmp.ne.s32.totalorder %s2010_s19, %s2703_s2  ;;  %p2709_p12 = scmp.lt.s32.totalorder %s2703_s2, %s2703_s2 }
 0x203   :  { %2352 = vmatpush3.bf16.msra.mxu0 %v2622_v54  ;;  %p2710_p13 = por %p2709_p12, %p2708_p11 }
 0x204   :  { %2353 = vmatprep.subr.bf16.mxu0 %v2623_v55 }
 0x205   :  { %p2711_p0 = pnand %p2710_p13, %p2704_p10 }
 0x207   :  { %2354 = vmatpush3.bf16.msra.mxu0 %v2624_v56 }
 0x208   :  { %2355 = vmatprep.subr.bf16.mxu0 %v2625_v57  ;;  %v1962_v57 = vand.u32 127, %v88_v8 }
 0x20b   :  { %2356 = vmatpush3.bf16.msra.mxu0 %v2626_v58 }
 0x20c   :  { %2357 = vmatprep.subr.bf16.mxu0 %v2627_v59 }
 0x20f   :  { %2358 = vmatpush3.bf16.msra.mxu0 %v2628_v60 }
 0x210   :  { %2359 = vmatprep.subr.bf16.mxu0 %v2629_v61  ;;  %v2763_v61 = vmov 0.0  }
 0x211   :  { %1992 = vst.msk [vmem:[#allocation9] sm:$0x1] %vm1991_vm2, %v2763_v61 }
 0x212   :  { %v2253_v0 = vpop.f32.mrb[8].mxu0 }
 0x213   :  { %2360 = vmatpush3.bf16.msra.mxu0 %v2630_v62  ;;  %v2254_v2 = vpop.f32.mrb[9].mxu0 }
 0x214   :  { %2361 = vmatprep.subr.bf16.mxu0 %v2631_v63  ;;  %v2255_v3 = vadd.f32 %v2254_v2, %v2253_v0  ;;  %v2256_v4 = vpop.f32.mrb[10].mxu0 }
 0x215   :  { %v2257_v5 = vpop.f32.mrb[11].mxu0 }
 0x217   :  { %2362 = vmatpush3.bf16.msra.mxu0 %v2632_v1 }
 0x231   :  { %v891_v14 = vpop.f32.mrb[4].mxu1 }
 0x232   :  { %v892_v15 = vadd.f32 %v891_v14, %v284_v11  ;;  %v893_v16 = vpop.f32.mrb[5].mxu1  ;;  %v2275_v17 = vpop.f32.mrb[12].mxu0 }
 0x233   :  { %v894_v18 = vadd.f32 %v893_v16, %v288_v13  ;;  %v895_v19 = vpop.f32.mrb[6].mxu1  ;;  %v2276_v20 = vpop.f32.mrb[13].mxu0 }
 0x234   :  { %v902_v21 = vmax.f32 %v892_v15, 0.0  ;;  %v896_v22 = vpop.f32.mrb[7].mxu1  ;;  %v2277_v23 = vadd.f32 %v2276_v20, %v2275_v17  ;;  %v2278_v24 = vpop.f32.mrb[14].mxu0 }
 0x235   :  { %v903_v25 = vmax.f32 %v894_v18, 0.0  ;;  %v2279_v28 = vpop.f32.mrb[15].mxu0 }
 0x236   :  { %v1489_v29 = vadd.f32 %v2277_v23, %v2255_v3  ;;  %v908_v9 = vpack.c.bf16 %v902_v21, %v902_v21 }
 0x237   :  { %v909_v30 = vpack.c.bf16 %v903_v25, %v903_v25 }
 0x239   :  { %1934 = vmatprep.mubr.bf16.mxu0 %v909_v30 }
 0x23a   :  { %1935 = vmatmul.mubr.bf16.vlgmr.msra.gmra.mrb[20].mxu0 %v908_v9 }
 0x251   :  { %v2297_v31 = vpop.f32.mrb[8].mxu1 }
 0x252   :  { %v2298_v27 = vpop.f32.mrb[9].mxu1 }
 0x253   :  { %v2299_v32 = vadd.f32 %v2298_v27, %v2297_v31  ;;  %v2300_v33 = vpop.f32.mrb[10].mxu1 }
 0x254   :  { %v2301_v34 = vpop.f32.mrb[11].mxu1 }
 0x255   :  { %v1529_v35 = vadd.f32 %v2299_v32, %v1489_v29 }
 0x2cd   :  { %v2319_v36 = vpop.f32.mrb[16].mxu0  ;;  %v2341_v37 = vpop.f32.mrb[12].mxu1 }
 0x2ce   :  { %v2320_v38 = vpop.f32.mrb[17].mxu0  ;;  %v2342_v39 = vpop.f32.mrb[13].mxu1 }
 0x2cf   :  { %v2321_v40 = vadd.f32 %v2320_v38, %v2319_v36  ;;  %v2343_v41 = vadd.f32 %v2342_v39, %v2341_v37  ;;  %v2322_v42 = vpop.f32.mrb[18].mxu0  ;;  %v2344_v43 = vpop.f32.mrb[14].mxu1 }
 0x2d0   :  { %v2323_v10 = vpop.f32.mrb[19].mxu0  ;;  %v2345_v44 = vpop.f32.mrb[15].mxu1 }
 0x2d1   :  { %v1857_v45 = vadd.f32 %v2321_v40, %v1529_v35 }
 0x2d3   :  { %v1897_v46 = vadd.f32 %v2343_v41, %v1857_v45 }
 0x30d   :  { %v2363_v47 = vpop.f32.mrb[20].mxu0 }
 0x30e   :  { %v2364_v48 = vpop.f32.mrb[21].mxu0 }
 0x30f   :  { %v2365_v12 = vadd.f32 %v2364_v48, %v2363_v47  ;;  %v2366_v49 = vpop.f32.mrb[22].mxu0 }
 0x310   :  { %v2367_v50 = vpop.f32.mrb[23].mxu0 }
 0x311   :  { %v1937_v51 = vadd.f32 %v2365_v12, %v1897_v46 }
 0x313   :  { %v1949_v52 = vadd.f32 %v2236_v26, %v1937_v51 }
 0x315   :  { %1950 = vst [vmem:[#allocation8] sm:$0xff] %v1949_v52  ;;  %1951 = vmax.xlane.f32.xlu0 %v1949_v52 }
 0x32b   :  { %1965 = vperm.xlu0 %2380, %v1963_v53  }
 0x3a2   :  { %v1952_v54 = vpop.xlane.xlu0 %1951 }
 0x3a3   :  { %v1953_v55 = vsub.f32 %v1949_v52, %v1952_v54 }
 0x3a5   :  { %v1954_v56 = vmul.f32 1.442695, %v1953_v55 }
 0x3a7   :  { %2633 = vpow2.f32 %v1954_v56 }
 0x3aa   :  { %v1966_v58 = vpop.permute.xlu0 %1965 }
 0x3ab   :  { %vm1967_vm1 = vcmp.eq.s32.totalorder %v1962_v57, %v1966_v58 }
 0x3ac   :  { %v1968_v60 = vsel %vm1967_vm1, %v1949_v52, 0.0 }
 0x3b1   :  { %v2634_v59 = vpop.eup %2633 }
 0x3b2   :  { %1956 = vadd.xlane.f32.xlu1 %v2634_v59 }
 0x3b6   :  { %1969 = vadd.xlane.f32.xlu1 %v1968_v60 }
 0x3b7   :  { %2714 = shalt.err (!%p2711_p0)
}
 0x3b8   :  { %s2715_s20 = scalar_lea.hbm %s2990_s10, 128 }
 0x3b9   :  { %p2716_p1 = scmp.ne.s32.totalorder %s2990_s10, %s2715_s20  ;;  %p2719_p2 = scmp.lt.u32.totalorder %s2715_s20, %s2990_s10 }
 0x3bb   :  { %p2721_p3 = pnand %p2719_p2, %p2716_p1 }
 0x3bd   :  { %2724 = shalt.err (!%p2721_p3)
}
 0x3be   :  { %2012 = dma.vmem_to_hbm [thread:$0]  %s2010_s19, 128, %s2990_s10, [#allocation4]   ;;  %v1993_v11 = vld [vmem:[#allocation9] sm:$0x1] }
 0x3bf   :  { %s2765_s27 = smov [#allocation9]  }
 0x3c0   :  { %s2019_s28 = sshll.u32 %s2765_s27, 4  ;;  %s2020_s28 = int_to_ptr.vmem [resolvable:$true] %s2019_s28 }
 0x3c1   :  { %s2725_s10 = scalar_lea.vmem %s2020_s28, 16  ;;  %s2729_s24 = scalar_lea.vmem %s2020_s28, 32 }
 0x3c2   :  { %p2726_p4 = scmp.ne.s32.totalorder %s2020_s28, %s2725_s10  ;;  %p2730_p5 = scmp.lt.s32.totalorder %s2020_s28, %s2020_s28 }
 0x3c3   :  { %p2731_p6 = scmp.lt.s32.totalorder %s2729_s24, %s2725_s10 }
 0x3c5   :  { %p2732_p7 = por %p2731_p6, %p2730_p5 }
 0x3c7   :  { %p2733_p8 = pnand %p2732_p7, %p2726_p4 }
 0x43f   :  { %v1957_v8 = vpop.xlane.xlu1 %1956 }
 0x440   :  { %2635 = vlog2.f32 %v1957_v8 }
 0x443   :  { %v1970_v1 = vpop.xlane.xlu1 %1969 }
 0x44a   :  { %v2636_v62 = vpop.eup %2635 }
 0x44b   :  { %v1959_v63 = vmul.f32 0.6931472, %v2636_v62 }
 0x44d   :  { %v1960_v0 = vadd.f32 %v1959_v63, %v1952_v54 }
 0x44f   :  { %v1979_v2 = vsub.f32 %v1960_v0, %v1970_v1 }
 0x451   :  { %v1981_v3 = vrot.slane %v1979_v2, 4 }
 0x453   :  { %v1982_v4 = vadd.f32 %v1981_v3, %v1979_v2 }
 0x455   :  { %v1983_v5 = vrot.slane %v1982_v4, 2 }
 0x457   :  { %v1984_v6 = vadd.f32 %v1983_v5, %v1982_v4 }
 0x459   :  { %v1985_v7 = vrot.slane %v1984_v6, 1 }
 0x45b   :  { %v1986_v13 = vadd.f32 %v1985_v7, %v1984_v6 }
 0x45d   :  { %v1994_v14 = vadd.f32 %v1993_v11, %v1986_v13 }
 0x45f   :  { %1996 = vst.msk [vmem:[#allocation9] sm:$0x1] %vm1991_vm2, %v1994_v14 }
 0x466   :  { %v2000_v15 = vld [vmem:[#allocation9] sm:$0x1] }
 0x467   :  { %v2001_v16 = vmul.f32 0.125, %v2000_v15 }
 0x469   :  { %2002 = vst.msk [vmem:[#allocation9] sm:$0x1] %vm1991_vm2, %v2001_v16 }
 0x46a   :  { %2736 = shalt.err (!%p2733_p8)
}
 0x46b   :  { %s2737_s25 = scalar_lea.hbm %s2991_s11, 16 }
 0x46c   :  { %p2738_p9 = scmp.ne.s32.totalorder %s2991_s11, %s2737_s25  ;;  %p2741_p10 = scmp.lt.u32.totalorder %s2737_s25, %s2991_s11 }
 0x46e   :  { %p2743_p11 = pnand %p2741_p10, %p2738_p9 }
 0x470   :  { %2746 = shalt.err (!%p2743_p11)
}
 0x471   :  { %2022 = dma.vmem_to_hbm [thread:$0]  %s2020_s28, 16, %s2991_s11, [#allocation10]  }
 0x472   :  { %2751 = dma.done.wait [#allocation4], 128  }
 0x473   :  { %2752 = vsyncadd [#allocation4], 4294967168 }
 0x474   :  { %2753 = dma.done.wait [#allocation10], 16  }
 0x475   :  { %2754 = vsyncadd [#allocation10], 4294967280 }
 0x476   :  { %2029 = vsyncpa [#allocation3], 1 }
 0x477   :  { %2030 = vsyncpa [#allocation6], 1 }
 0x478   :  { %2031 = vsyncpa [#allocation4], 1 }
 0x479   :  { %2032 = vsyncpa [#allocation10], 1 }

</bundles_post_ra>
